<compile_context>
chip_gen: v7x
topology: tpu7x:2x2x1
jax: 0.10.0
libtpu: 0.0.40
codegen_flags: <defaults>
</compile_context>

<pallas_src>
import functools
import math

import jax
import jax.numpy as jnp
from jax.experimental import pallas as pl
from jax.experimental.pallas import tpu as pltpu


def build_pe_table(d_model: int, max_len: int = 5000) -> jnp.ndarray:
    """PyTorch-equivalent positional-encoding table, shape (max_len, 1, d_model), f32."""
    position = jnp.arange(0, max_len, dtype=jnp.float32)[:, None]            # (max_len, 1)
    div_term = jnp.exp(
        jnp.arange(0, d_model, 2, dtype=jnp.float32) * (-math.log(10000.0) / d_model)
    )                                                                         # (d_model//2,)
    pe = jnp.zeros((max_len, d_model), dtype=jnp.float32)
    pe = pe.at[:, 0::2].set(jnp.sin(position * div_term))
    pe = pe.at[:, 1::2].set(jnp.cos(position * div_term))
    return pe[:, None, :]                                                     # (max_len, 1, d_model)


def _pe_add_3d_kernel(x_ref, pe_ref, o_ref):
    # x_ref/o_ref: (tile_s, batch, d_model); pe_ref: (tile_s, 1, d_model) f32.
    # Sublane broadcast of pe over batch happens in-kernel (free vs. DMA time);
    # add in f32, cast on store.
    o_ref[...] = (x_ref[...] + pe_ref[...]).astype(o_ref.dtype)


def _pe_add_2d_kernel(x_ref, pe_ref, o_ref, *, batch):
    # x_ref/o_ref: (tile_s, batch*d_model); pe_ref: (tile_s, d_model) f32.
    # Lane-replicate pe across batch once per grid step (cheap VPU/XLU work,
    # completely hidden under the HBM DMAs).
    pe_row = jnp.concatenate([pe_ref[...]] * batch, axis=-1)
    o_ref[...] = (x_ref[...] + pe_row).astype(o_ref.dtype)


def _device_tuning():
    """(is_v7x, target x-tile bytes, scoped VMEM limit) per TPU generation."""
    try:
        kind = jax.devices()[0].device_kind.lower()
    except Exception:  # pragma: no cover - CPU interpret / unknown backend
        kind = ""
    if "v7" in kind:
        # v7x: only 64 MiB VMEM per TensorCore -> smaller tiles, tighter cap.
        return True, 3 * 1024 * 1024, 48 * 1024 * 1024
    # v5e / v6e: 128 MiB physical VMEM -> bigger tiles to amortize per-step
    # overhead; raise the scoped limit well past v5e's 16 MiB default.
    return False, 6 * 1024 * 1024, 64 * 1024 * 1024


def positional_encoding_forward(x: jnp.ndarray, pe: jnp.ndarray) -> jnp.ndarray:
    """x: (seq, batch, d_model), pe: (max_len, 1, d_model) f32 -> x + pe[:seq]."""
    seq, batch, d_model = x.shape
    is_v7x, target_tile_bytes, vmem_limit = _device_tuning()

    # pe[:seq] stays f32 and un-broadcast; the batch broadcast is done in-kernel.
    pe_seq = pe[:seq]                                        # (seq, 1, d_model) f32

    # Sequence tile sized so one grid step streams ~target_tile_bytes of x.
    row_bytes = batch * d_model * jnp.dtype(x.dtype).itemsize
    tile_s = max(8, target_tile_bytes // max(row_bytes, 1))
    if is_v7x and seq >= 16:
        # Guarantee >= 2 grid steps so ("parallel",) shards across both TCs.
        tile_s = min(tile_s, pl.cdiv(seq, 2))
    if tile_s >= seq:
        tile_s = seq                                         # single full block
    else:
        tile_s = max(8, (tile_s // 8) * 8)                   # sublane-aligned
    grid = (pl.cdiv(seq, tile_s),)                           # cdiv: no divisibility assert

    cost = pl.CostEstimate(
        flops=seq * batch * d_model,
        bytes_accessed=int(2 * seq * batch * d_model * jnp.dtype(x.dtype).itemsize
                           + seq * d_model * 4),
        transcendentals=0,
    )
    cparams = pltpu.CompilerParams(
        dimension_semantics=("parallel",),                   # megacore split on v7x
        vmem_limit_bytes=vmem_limit,
    )

    if d_model >= 128:
        # Lane dim already dense: keep x 3-D, pe tile is 1/batch the size of x tile.
        return pl.pallas_call(
            _pe_add_3d_kernel,
            out_shape=jax.ShapeDtypeStruct((seq, batch, d_model), x.dtype),
            grid_spec=pltpu.PrefetchScalarGridSpec(
                num_scalar_prefetch=0,
                grid=grid,
                in_specs=[
                    pl.BlockSpec((tile_s, batch, d_model), lambda i: (i, 0, 0)),
                    pl.BlockSpec((tile_s, 1, d_model), lambda i: (i, 0, 0)),
                ],
                out_specs=pl.BlockSpec((tile_s, batch, d_model), lambda i: (i, 0, 0)),
            ),
            compiler_params=cparams,
            cost_estimate=cost,
            input_output_aliases={0: 0},                     # in-place on the x slab
        )(x, pe_seq)

    # Narrow d_model: lane-dense 2-D view of x; pe stays (seq, d_model) and is
    # replicated across batch inside the kernel.
    x2 = x.reshape(seq, batch * d_model)
    pe2 = pe_seq.reshape(seq, d_model)
    out2 = pl.pallas_call(
        functools.partial(_pe_add_2d_kernel, batch=batch),
        out_shape=jax.ShapeDtypeStruct((seq, batch * d_model), x.dtype),
        grid_spec=pltpu.PrefetchScalarGridSpec(
            num_scalar_prefetch=0,
            grid=grid,
            in_specs=[
                pl.BlockSpec((tile_s, batch * d_model), lambda i: (i, 0)),
                pl.BlockSpec((tile_s, d_model), lambda i: (i, 0)),
            ],
            out_specs=pl.BlockSpec((tile_s, batch * d_model), lambda i: (i, 0)),
        ),
        compiler_params=cparams,
        cost_estimate=cost,
        input_output_aliases={0: 0},                         # in-place on the x slab
    )(x2, pe2)
    return out2.reshape(seq, batch, d_model)


if __name__ == "__main__":
    # Small shapes consistent with the module: seq=8, batch=2, d_model=32.
    seq_len, batch, d_model = 8, 2, 32
    max_len = 5000

    key = jax.random.PRNGKey(0)
    x = jax.random.normal(key, (seq_len, batch, d_model), dtype=jnp.float32)

    pe = build_pe_table(d_model, max_len=max_len)

    out = jax.block_until_ready(positional_encoding_forward(x, pe))

    # Sanity check against the plain-JAX reference of the PyTorch forward.
    ref = x + pe[:seq_len]
    assert out.shape == (seq_len, batch, d_model)
    assert jnp.allclose(out, ref, atol=1e-6, rtol=1e-6)

    print("KERNEL_OK")
</pallas_src>

<mosaic_0001>
module attributes {stable_mosaic.version = 11 : i64} {
  func.func @_pe_add_2d_kernel(%arg0: i32, %arg1: memref<8x64xf32, #tpu.memory_space<vmem>>, %arg2: memref<8x32xf32, #tpu.memory_space<vmem>>, %arg3: memref<8x64xf32, #tpu.memory_space<vmem>>) attributes {dimension_semantics = [#tpu.dimension_semantics<parallel>], iteration_bounds = array<i64: 1>, scalar_prefetch = 0 : i64, scratch_operands = 0 : i64, tpu.core_type = #tpu.core_type<tc>, window_params = [{transform_indices = @transform_0, window_bounds = array<i64: 8, 64>}, {transform_indices = @transform_1, window_bounds = array<i64: 8, 32>}, {transform_indices = @transform_2, window_bounds = array<i64: 8, 64>}]} {
    %c0 = arith.constant 0 : index
    %c0_0 = arith.constant 0 : index
    %0 = vector.load %arg2[%c0, %c0_0] : memref<8x32xf32, #tpu.memory_space<vmem>>, vector<8x32xf32>
    %1 = tpu.concatenate %0, %0 in 1 : vector<8x32xf32>, vector<8x32xf32> -> vector<8x64xf32>
    %c0_1 = arith.constant 0 : index
    %c0_2 = arith.constant 0 : index
    %2 = vector.load %arg1[%c0_1, %c0_2] : memref<8x64xf32, #tpu.memory_space<vmem>>, vector<8x64xf32>
    %3 = arith.addf %2, %1 : vector<8x64xf32>
    %c0_3 = arith.constant 0 : index
    %c0_4 = arith.constant 0 : index
    %4 = vector.load %arg3[%c0_3, %c0_4] : memref<8x64xf32, #tpu.memory_space<vmem>>, vector<8x64xf32>
    tpu.vector_store %arg3[%c0_3, %c0_4], %3 {strides = array<i32>} : memref<8x64xf32, #tpu.memory_space<vmem>>, vector<8x64xf32>,
    return
  }
  func.func @transform_0(%arg0: i32) -> (i32, i32) {
    %c0_i32 = arith.constant 0 : i32
    %c0_i32_0 = arith.constant 0 : i32
    return %arg0, %c0_i32 : i32, i32
  }
  func.func @transform_1(%arg0: i32) -> (i32, i32) {
    %c0_i32 = arith.constant 0 : i32
    %c0_i32_0 = arith.constant 0 : i32
    return %arg0, %c0_i32 : i32, i32
  }
  func.func @transform_2(%arg0: i32) -> (i32, i32) {
    %c0_i32 = arith.constant 0 : i32
    %c0_i32_0 = arith.constant 0 : i32
    return %arg0, %c0_i32 : i32, i32
  }
}

</mosaic_0001>

<bundles_post_ra>
// kernel: tpu_custom_call.1
= control target key start
LH: loop header
LB: loop body
LE: loop exit
PB: predicated region body
PF: predicated region fallthrough
CT: control target
= control target key end

     0   :  { %7 = vsyncpa [#allocation3], 0  ;;  %s194_s0 = inlined_call_operand.hbm [shape: f32[8,64], index: 0, kind: input, shape index: {}, may-alias: {0,2}]   ;;  %s195_s1 = inlined_call_operand.hbm [shape: f32[8,32], index: 1, kind: input, shape index: {}]   ;;  %s196_s2 = inlined_call_operand.hbm [shape: f32[8,64], index: 2, kind: output, shape index: {}, may-alias: {0,2}]  }
   0x1   :  { %8 = vsyncpa [#allocation6], 0 }
   0x2   :  { %9 = vsyncpa [#allocation4], 0  ;;  %s139_s9 = smov [#allocation2]   ;;  %s140_s11 = smov [#allocation5]  }
   0x3   :  { %s16_s10 = sshll.u32 %s139_s9, 4  ;;  %s26_s12 = sshll.u32 %s140_s11, 4  ;;  %s17_s10 = int_to_ptr.vmem [resolvable:$true] %s16_s10  ;;  %s27_s12 = int_to_ptr.vmem [resolvable:$true] %s26_s12 }
   0x4   :  { %s67_s15 = scalar_lea.hbm %s194_s0, 128 }
   0x5   :  { %p68_p0 = scmp.ne.s32.totalorder %s194_s0, %s67_s15  ;;  %p71_p1 = scmp.lt.u32.totalorder %s67_s15, %s194_s0 }
   0x7   :  { %p73_p2 = pnand %p71_p1, %p68_p0 }
   0x9   :  { %76 = shalt.err (!%p73_p2)
}
   0xa   :  { %s77_s20 = scalar_lea.vmem %s17_s10, 128  ;;  %p82_p4 = scmp.lt.s32.totalorder %s17_s10, %s17_s10 }
   0xb   :  { %p78_p3 = scmp.ne.s32.totalorder %s17_s10, %s77_s20  ;;  %p83_p5 = scmp.lt.s32.totalorder %s77_s20, %s77_s20 }
   0xd   :  { %p84_p6 = por %p83_p5, %p82_p4 }
   0xf   :  { %p85_p7 = pnand %p84_p6, %p78_p3 }
  0x11   :  { %88 = shalt.err (!%p85_p7)
}
  0x12   :  { %19 = dma.hbm_to_vmem [thread:$0]  %s194_s0, 128, %s17_s10, [#allocation3]  }
  0x13   :  { %s89_s25 = scalar_lea.hbm %s195_s1, 128 }
  0x14   :  { %p90_p8 = scmp.ne.s32.totalorder %s195_s1, %s89_s25  ;;  %p93_p9 = scmp.lt.u32.totalorder %s89_s25, %s195_s1 }
  0x16   :  { %p95_p10 = pnand %p93_p9, %p90_p8 }
  0x18   :  { %98 = shalt.err (!%p95_p10)
}
  0x19   :  { %s99_s30 = scalar_lea.vmem %s27_s12, 128  ;;  %p104_p12 = scmp.lt.s32.totalorder %s27_s12, %s27_s12 }
  0x1a   :  { %p100_p11 = scmp.ne.s32.totalorder %s27_s12, %s99_s30  ;;  %p105_p13 = scmp.lt.s32.totalorder %s99_s30, %s99_s30 }
  0x1c   :  { %p106_p0 = por %p105_p13, %p104_p12 }
  0x1e   :  { %p107_p1 = pnand %p106_p0, %p100_p11 }
  0x20   :  { %110 = shalt.err (!%p107_p1)
}
  0x21   :  { %29 = dma.hbm_to_vmem [thread:$0]  %s195_s1, 128, %s27_s12, [#allocation6]  }
  0x22   :  { %133 = dma.done.wait [#allocation3], 128  }
  0x23   :  { %134 = vsyncadd [#allocation3], 4294967168 }
  0x24   :  { %135 = dma.done.wait [#allocation6], 128  }
  0x25   :  { %136 = vsyncadd [#allocation6], 4294967168  ;;  %v36_v0 = vld [vmem:[#allocation5] sm:$0xff]  ;;  %s141_s4 = smov 32   ;;  %vm41_vm0 = vcmask 261120   ;;  %v43_v1 = vld [vmem:[#allocation2] sm:$0xff] }
  0x26   :  { %38 = vrot.lane.b32.xlu0 %v36_v0, %s141_s4  ;;  %s142_s5 = smov [#allocation7]   ;;  %vm45_vm1 = vcmask 523264  }
  0x27   :  { %s53_s6 = sshll.u32 %s142_s5, 4  ;;  %s54_s6 = int_to_ptr.vmem [resolvable:$true] %s53_s6 }
  0x28   :  { %s111_s7 = scalar_lea.vmem %s54_s6, 128  ;;  %p116_p3 = scmp.lt.s32.totalorder %s54_s6, %s54_s6 }
  0x29   :  { %p112_p2 = scmp.ne.s32.totalorder %s54_s6, %s111_s7  ;;  %p117_p4 = scmp.lt.s32.totalorder %s111_s7, %s111_s7 }
  0x2b   :  { %p118_p5 = por %p117_p4, %p116_p3 }
  0x2d   :  { %p119_p6 = pnand %p118_p5, %p112_p2 }
  0x98   :  { %v39_v2 = vpop.permute.xlu0 %38 }
  0x99   :  { %v42_v3 = vsel %vm41_vm0, %v36_v0, %v39_v2 }
  0x9a   :  { %v44_v4 = vadd.f32 %v43_v1, %v42_v3 }
  0x9c   :  { %46 = vst.msk [vmem:[#allocation7] sm:$0xff] %vm45_vm1, %v44_v4 }
  0x9d   :  { %122 = shalt.err (!%p119_p6)
}
  0x9e   :  { %s123_s9 = scalar_lea.hbm %s196_s2, 128 }
  0x9f   :  { %p124_p7 = scmp.ne.s32.totalorder %s196_s2, %s123_s9  ;;  %p127_p8 = scmp.lt.u32.totalorder %s123_s9, %s196_s2 }
  0xa1   :  { %p129_p9 = pnand %p127_p8, %p124_p7 }
  0xa3   :  { %132 = shalt.err (!%p129_p9)
}
  0xa4   :  { %56 = dma.vmem_to_hbm [thread:$0]  %s54_s6, 128, %s196_s2, [#allocation4]  }
  0xa5   :  { %137 = dma.done.wait [#allocation4], 128  }
  0xa6   :  { %138 = vsyncadd [#allocation4], 4294967168 }
  0xa7   :  { %60 = vsyncpa [#allocation3], 1 }
  0xa8   :  { %61 = vsyncpa [#allocation6], 1 }
  0xa9   :  { %62 = vsyncpa [#allocation4], 1 }

</bundles_post_ra>
